<compile_context>
chip_gen: v7x
topology: tpu7x:2x2x1
jax: 0.10.0
libtpu: 0.0.40
codegen_flags: <defaults>
</compile_context>

<pallas_src>
import jax
import jax.numpy as jnp
from jax.experimental import pallas as pl
from jax.experimental.pallas import tpu as pltpu


def xor_kernel(x_ref, w1_ref, b1_ref, w2_ref, b2_ref, o_ref):
    x = x_ref[...]                        # [4, TB]  features x batch-tile (lanes)
    w1 = w1_ref[...]                      # [H, 4]
    # Layer 1 on the VPU: z1[h, b] = sum_k w1[h, k] * x[k, b]
    # (4 broadcast FMAs; the problem is far too small to fill even one MXU pass).
    z1 = w1[:, 0:1] * x[0:1, :]
    for k in range(1, 4):
        z1 = z1 + w1[:, k:k + 1] * x[k:k + 1, :]
    a1 = jnp.maximum(z1 + b1_ref[...], 0.0)                   # [H, TB]  bias + ReLU
    # Layer 2: lane-broadcast multiply then sublane (XLU) reduction over H.
    z2 = jnp.sum(a1 * w2_ref[...], axis=0, keepdims=True)     # [1, TB]
    o_ref[...] = jax.nn.sigmoid(z2 + b2_ref[0])               # scalar bias from SMEM


def xor_forward(x, w1, b1, w2, b2, *, tb=128):
    """x: [B, 4]; w1: [H, 4]; b1: [H]; w2: [1, H]; b2: [1]  (PyTorch layout)."""
    B = x.shape[0]
    H = w1.shape[0]
    nb = pl.cdiv(B, tb)
    b_pad = nb * tb

    # Wrapper-side layout plumbing (fused by XLA): put the batch on the lane axis.
    xT = x.T.astype(jnp.float32)                              # [4, B]
    if b_pad != B:
        xT = jnp.pad(xT, ((0, 0), (0, b_pad - B)))
    w1f = w1.astype(jnp.float32)                              # [H, 4]
    b1c = b1.reshape(H, 1).astype(jnp.float32)                # broadcasts along lanes
    w2c = w2.reshape(H, 1).astype(jnp.float32)                # broadcasts along lanes
    b2s = b2.reshape(1).astype(jnp.float32)                   # scalar -> SMEM

    y = pl.pallas_call(
        xor_kernel,
        out_shape=jax.ShapeDtypeStruct((1, b_pad), jnp.float32),
        grid=(nb,),
        in_specs=[
            pl.BlockSpec((4, tb), lambda i: (0, i)),              # x batch tile
            pl.BlockSpec((H, 4), lambda i: (0, 0)),               # w1 (resident)
            pl.BlockSpec((H, 1), lambda i: (0, 0)),               # b1 (resident)
            pl.BlockSpec((H, 1), lambda i: (0, 0)),               # w2 (resident)
            pl.BlockSpec(memory_space=pltpu.MemorySpace.SMEM),    # b2 scalar
        ],
        out_specs=pl.BlockSpec((1, tb), lambda i: (0, i)),        # lane-dense output
        compiler_params=pltpu.CompilerParams(
            dimension_semantics=("parallel",),   # batch axis shards across TCs on v7x
        ),
    )(xT, w1f, b1c, w2c, b2s)

    return y[:, :B].T                                             # back to [B, 1]


def init_params(key, hidden1):
    # PyTorch nn.Linear default init: U(-1/sqrt(fan_in), 1/sqrt(fan_in)).
    k1, k2, k3, k4 = jax.random.split(key, 4)
    bound1 = 1.0 / jnp.sqrt(4.0)
    w1 = jax.random.uniform(k1, (hidden1, 4), jnp.float32, -bound1, bound1)
    b1 = jax.random.uniform(k2, (hidden1,), jnp.float32, -bound1, bound1)
    bound2 = 1.0 / jnp.sqrt(float(hidden1))
    w2 = jax.random.uniform(k3, (1, hidden1), jnp.float32, -bound2, bound2)
    b2 = jax.random.uniform(k4, (1,), jnp.float32, -bound2, bound2)
    return w1, b1, w2, b2


if __name__ == "__main__":
    key = jax.random.PRNGKey(0)
    k_x, k_p = jax.random.split(key)

    B, H = 256, 32    # batch tiled in 128-lane blocks; hidden1 = 32
    x = jax.random.normal(k_x, (B, 4), jnp.float32)
    w1, b1, w2, b2 = init_params(k_p, H)

    y = xor_forward(x, w1, b1, w2, b2)
    y = jax.block_until_ready(y)

    # Plain-JAX reference with PyTorch nn.Linear semantics.
    a1_ref = jnp.maximum(x @ w1.T + b1, 0.0)
    y_ref = jax.nn.sigmoid(a1_ref @ w2.T + b2)
    assert y.shape == (B, 1)
    assert jnp.allclose(y, y_ref, atol=1e-5, rtol=1e-5), "mismatch vs reference"

    # TODO(synk): XOR.loss (binary_cross_entropy) is a training-time scalar loss,
    # intentionally left to plain JAX rather than a Pallas kernel.
    print("KERNEL_OK")
</pallas_src>

<mosaic_0001>
module attributes {stable_mosaic.version = 11 : i64} {
  func.func @xor_kernel(%arg0: i32, %arg1: memref<4x128xf32, #tpu.memory_space<vmem>>, %arg2: memref<32x4xf32, #tpu.memory_space<vmem>>, %arg3: memref<32x1xf32, #tpu.memory_space<vmem>>, %arg4: memref<32x1xf32, #tpu.memory_space<vmem>>, %arg5: memref<1xf32, #tpu.memory_space<smem>>, %arg6: memref<1x128xf32, #tpu.memory_space<vmem>>) attributes {dimension_semantics = [#tpu.dimension_semantics<parallel>], iteration_bounds = array<i64: 2>, scalar_prefetch = 0 : i64, scratch_operands = 0 : i64, tpu.core_type = #tpu.core_type<tc>, window_params = [{transform_indices = @transform_0, window_bounds = array<i64: 4, 128>}, {pipeline_mode = #tpu.pipeline_mode<synchronous>, transform_indices = @transform_1, window_bounds = array<i64: 32, 4>}, {pipeline_mode = #tpu.pipeline_mode<synchronous>, transform_indices = @transform_2, window_bounds = array<i64: 32, 1>}, {pipeline_mode = #tpu.pipeline_mode<synchronous>, transform_indices = @transform_3, window_bounds = array<i64: 32, 1>}, {transform_indices = @transform_4, window_bounds = array<i64: 1>}, {transform_indices = @transform_5, window_bounds = array<i64: 1, 128>}]} {
    %c0 = arith.constant 0 : index
    %c0_0 = arith.constant 0 : index
    %0 = vector.load %arg1[%c0, %c0_0] : memref<4x128xf32, #tpu.memory_space<vmem>>, vector<4x128xf32>
    %c0_1 = arith.constant 0 : index
    %c0_2 = arith.constant 0 : index
    %1 = vector.load %arg2[%c0_1, %c0_2] : memref<32x4xf32, #tpu.memory_space<vmem>>, vector<32x4xf32>
    %2 = vector.extract_strided_slice %1 {offsets = [0, 0], sizes = [32, 1], strides = [1, 1]} : vector<32x4xf32> to vector<32x1xf32>
    %3 = vector.extract_strided_slice %0 {offsets = [0, 0], sizes = [1, 128], strides = [1, 1]} : vector<4x128xf32> to vector<1x128xf32>
    %4 = vector.broadcast %2 : vector<32x1xf32> to vector<32x128xf32>
    %5 = vector.broadcast %3 : vector<1x128xf32> to vector<32x128xf32>
    %6 = arith.mulf %4, %5 : vector<32x128xf32>
    %7 = vector.extract_strided_slice %1 {offsets = [0, 1], sizes = [32, 1], strides = [1, 1]} : vector<32x4xf32> to vector<32x1xf32>
    %8 = vector.extract_strided_slice %0 {offsets = [1, 0], sizes = [1, 128], strides = [1, 1]} : vector<4x128xf32> to vector<1x128xf32>
    %9 = vector.broadcast %7 : vector<32x1xf32> to vector<32x128xf32>
    %10 = vector.broadcast %8 : vector<1x128xf32> to vector<32x128xf32>
    %11 = arith.mulf %9, %10 : vector<32x128xf32>
    %12 = arith.addf %6, %11 : vector<32x128xf32>
    %13 = vector.extract_strided_slice %1 {offsets = [0, 2], sizes = [32, 1], strides = [1, 1]} : vector<32x4xf32> to vector<32x1xf32>
    %14 = vector.extract_strided_slice %0 {offsets = [2, 0], sizes = [1, 128], strides = [1, 1]} : vector<4x128xf32> to vector<1x128xf32>
    %15 = vector.broadcast %13 : vector<32x1xf32> to vector<32x128xf32>
    %16 = vector.broadcast %14 : vector<1x128xf32> to vector<32x128xf32>
    %17 = arith.mulf %15, %16 : vector<32x128xf32>
    %18 = arith.addf %12, %17 : vector<32x128xf32>
    %19 = vector.extract_strided_slice %1 {offsets = [0, 3], sizes = [32, 1], strides = [1, 1]} : vector<32x4xf32> to vector<32x1xf32>
    %20 = vector.extract_strided_slice %0 {offsets = [3, 0], sizes = [1, 128], strides = [1, 1]} : vector<4x128xf32> to vector<1x128xf32>
    %21 = vector.broadcast %19 : vector<32x1xf32> to vector<32x128xf32>
    %22 = vector.broadcast %20 : vector<1x128xf32> to vector<32x128xf32>
    %23 = arith.mulf %21, %22 : vector<32x128xf32>
    %24 = arith.addf %18, %23 : vector<32x128xf32>
    %c0_3 = arith.constant 0 : index
    %c0_4 = arith.constant 0 : index
    %25 = vector.load %arg3[%c0_3, %c0_4] : memref<32x1xf32, #tpu.memory_space<vmem>>, vector<32x1xf32>
    %26 = vector.broadcast %25 : vector<32x1xf32> to vector<32x128xf32>
    %27 = arith.addf %24, %26 : vector<32x128xf32>
    %cst = arith.constant 0.000000e+00 : f32
    %28 = vector.broadcast %cst : f32 to vector<32x128xf32>
    %29 = arith.maximumf %27, %28 : vector<32x128xf32>
    %c0_5 = arith.constant 0 : index
    %c0_6 = arith.constant 0 : index
    %30 = vector.load %arg4[%c0_5, %c0_6] : memref<32x1xf32, #tpu.memory_space<vmem>>, vector<32x1xf32>
    %31 = vector.broadcast %30 : vector<32x1xf32> to vector<32x128xf32>
    %32 = arith.mulf %29, %31 : vector<32x128xf32>
    %cst_7 = arith.constant dense<0.000000e+00> : vector<128xf32>
    %33 = vector.multi_reduction <add>, %32, %cst_7 [0] : vector<32x128xf32> to vector<128xf32>
    %34 = vector.shape_cast %33 : vector<128xf32> to vector<1x128xf32>
    %c0_8 = arith.constant 0 : index
    %35 = memref.load %arg5[%c0_8] : memref<1xf32, #tpu.memory_space<smem>>
    %36 = vector.broadcast %35 : f32 to vector<1x128xf32>
    %37 = arith.addf %34, %36 : vector<1x128xf32>
    %38 = arith.negf %37 : vector<1x128xf32>
    %39 = math.exp %38 : vector<1x128xf32>
    %cst_9 = arith.constant 1.000000e+00 : f32
    %40 = vector.broadcast %cst_9 : f32 to vector<1x128xf32>
    %41 = arith.addf %40, %39 : vector<1x128xf32>
    %42 = arith.divf %40, %41 : vector<1x128xf32>
    %c0_10 = arith.constant 0 : index
    %c0_11 = arith.constant 0 : index
    %43 = vector.load %arg6[%c0_10, %c0_11] : memref<1x128xf32, #tpu.memory_space<vmem>>, vector<1x128xf32>
    tpu.vector_store %arg6[%c0_10, %c0_11], %42 {strides = array<i32>} : memref<1x128xf32, #tpu.memory_space<vmem>>, vector<1x128xf32>,
    return
  }
  func.func @transform_0(%arg0: i32) -> (i32, i32) {
    %c0_i32 = arith.constant 0 : i32
    %c0_i32_0 = arith.constant 0 : i32
    return %c0_i32, %arg0 : i32, i32
  }
  func.func @transform_1(%arg0: i32) -> (i32, i32) {
    %c0_i32 = arith.constant 0 : i32
    %c0_i32_0 = arith.constant 0 : i32
    %c0_i32_1 = arith.constant 0 : i32
    return %c0_i32, %c0_i32_0 : i32, i32
  }
  func.func @transform_2(%arg0: i32) -> (i32, i32) {
    %c0_i32 = arith.constant 0 : i32
    %c0_i32_0 = arith.constant 0 : i32
    %c0_i32_1 = arith.constant 0 : i32
    return %c0_i32, %c0_i32_0 : i32, i32
  }
  func.func @transform_3(%arg0: i32) -> (i32, i32) {
    %c0_i32 = arith.constant 0 : i32
    %c0_i32_0 = arith.constant 0 : i32
    %c0_i32_1 = arith.constant 0 : i32
    return %c0_i32, %c0_i32_0 : i32, i32
  }
  func.func @transform_4(%arg0: i32) -> i32 {
    %c0_i32 = arith.constant 0 : i32
    %c0_i32_0 = arith.constant 0 : i32
    return %c0_i32 : i32
  }
  func.func @transform_5(%arg0: i32) -> (i32, i32) {
    %c0_i32 = arith.constant 0 : i32
    %c0_i32_0 = arith.constant 0 : i32
    return %c0_i32, %arg0 : i32, i32
  }
}

</mosaic_0001>

<bundles_post_ra>
// kernel: tpu_custom_call.1
= control target key start
LH: loop header
LB: loop body
LE: loop exit
PB: predicated region body
PF: predicated region fallthrough
CT: control target
= control target key end

     0   :  { %s790_s0 = inlined_call_operand.vmem [shape: f32[4,256], index: 0, kind: input, shape index: {}]   ;;  %s791_s1 = inlined_call_operand.vmem [shape: f32[32,4], index: 1, kind: input, shape index: {}]   ;;  %s792_s2 = inlined_call_operand.vmem [shape: f32[32,1], index: 2, kind: input, shape index: {}]   ;;  %s793_s3 = inlined_call_operand.vmem [shape: f32[32,1], index: 3, kind: input, shape index: {}]   ;;  %s794_s4 = inlined_call_operand.<no memory space> [shape: f32[1], index: 4, kind: input, shape index: {}]   ;;  %s795_s5 = inlined_call_operand.hbm [shape: f32[1,256], index: 5, kind: output, shape index: {}]  }
   0x1   :  { %10 = sst [smem:[#allocation2]] %s794_s4 }
   0x2   :  { %11 = vsyncpa [#allocation4], 0 }
   0x3   :  { %13 = vsyncpa [#allocation4 + $0x1], 0  ;;  %s654_s20 = smov 0   ;;  %s656_s21 = smov 0  }
   0x4   :  { %s658_s22 = smov 0   ;;  %s660_s23 = smov 0  }
   0x5 LB: > { %s675_s4 = sadd.s32 4294967295, %s614_s23   ;;  %s484_s24 = sadd.s32 4294967294, %s614_s23   ;;  %s614_s23 = sphi %s660_s23, %s801_s23   ;;  %s610_s22 = sphi %s658_s22, %s800_s22   ;;  %s606_s21 = sphi %s656_s21, %s799_s21   ;;  %s602_s20 = sphi %s654_s20, %s798_s20  }
   0x6   : > { %s679_s25 = sadd.s32 1, %s614_s23   ;;  %s136_s26 = sadd.s32 1, %s610_s22 }
   0x7   : > { %s133_s27 = ssub.s32 %s614_s23, %s679_s25  ;;  %p146_p0 = scmp.ne.s32.totalorder %s610_s22, %s606_s21 }
   0x8   : > { %p134_p1 = scmp.eq.s32.totalorder %s133_s27, 0  ;;  %p147_p2 = scmp.eq.s32.totalorder %s675_s4, 1 }
   0x9   : > { %p152_p3 = scmp.ne.s32.totalorder %s606_s21, %s602_s20  ;;  %p153_p4 = scmp.eq.s32.totalorder %s484_s24, 1 }
   0xa   : > { %s690_s28 = scalar_select %p134_p1, %s610_s22, %s136_s26  }
   0xb   : > { %p692_p5 = por %p147_p2, %p146_p0  ;;  %p696_p6 = por %p153_p4, %p152_p3 }
   0xc   : > { %p487_p7 = scmp.ge.s32.totalorder %s614_s23, 1  ;;  %p190_p8 = scmp.lt.s32.totalorder %s614_s23, 3 }
   0xe   : > { %p191_p9 = pnand %p487_p7, %p190_p8 }
   0xf   : > { %v221_v0 = vld [vmem:[%s791_s1] sm:$0xff] (!%p191_p9)  ;;  %v616_v1 = vmov (!%p191_p9), 2   ;;  %v617_v2 = vmov (!%p191_p9), 1   ;;  %v222_v3 = vld [vmem:[%s791_s1 + $0x8] sm:$0xff] (!%p191_p9)  ;;  %v224_v4 = vld [vmem:[%s791_s1 + $0x18] sm:$0xff] (!%p191_p9)  ;;  %v618_v6 = vmov (!%p191_p9), 3   ;;  %v245_v25 = vlaneseq (!%p191_p9) }
  0x10   : > { %194 = sbr.rel (%p191_p9) target bundleno = 262 (0x106), region = 40  ;;  %537 = vset.pattern.permute.xlu0 (!%p191_p9), %v616_v1  ;;  %536 = vset.pattern.permute.xlu1 (!%p191_p9), %v617_v2  ;;  %v223_v5 = vld [vmem:[%s791_s1 + $0x10] sm:$0xff] (!%p191_p9)  ;;  %v619_v7 = vmov (!%p191_p9), 0   ;;  %v338_v8 = vld [vmem:[%s792_s2 + $0x8] sm:$0xff] (!%p191_p9)  ;;  %v369_v9 = vld [vmem:[%s793_s3] sm:$0xff] (!%p191_p9)  ;;  %p216_p10 = scmp.lt.s32.totalorder (!%p191_p9), %s675_s4, 1 }
  0x11   : > { %282 = vperm.xlu0 (!%p191_p9), %537, %v221_v0   ;;  %254 = vperm.xlu1 (!%p191_p9), %536, %v221_v0   ;;  %v371_v10 = vld [vmem:[%s793_s3 + $0x10] sm:$0xff] (!%p191_p9)  ;;  %v337_v11 = vld [vmem:[%s792_s2] sm:$0xff] (!%p191_p9)  ;;  %v340_v13 = vld [vmem:[%s792_s2 + $0x18] sm:$0xff] (!%p191_p9)  ;;  %v246_v28 = vshrl.u32 (!%p191_p9), %v245_v25, 7  ;;  %s406_s18 = sld [smem:[#allocation2]] (!%p191_p9)  ;;  %s214_s19 = sand.u32 (!%p191_p9), 1, %s606_s21  }
  0x12   : > { %v339_v12 = vld [vmem:[%s792_s2 + $0x10] sm:$0xff] (!%p191_p9)  ;;  %v370_v14 = vld [vmem:[%s793_s3 + $0x8] sm:$0xff] (!%p191_p9)  ;;  %v372_v15 = vld [vmem:[%s793_s3 + $0x18] sm:$0xff] (!%p191_p9)  ;;  %s490_s24 = sshll.u32 (!%p191_p9), %s675_s4, 4  ;;  %s215_s26 = scalar_lea.vmem (!%p191_p9), [#allocation3], %s214_s19 }
  0x13   : > { %v247_v29 = vsub.s32 (!%p191_p9), 0, %v246_v28  ;;  %v271_v32 = vsub.s32 (!%p191_p9), 1, %v246_v28  ;;  %v299_v34 = vsub.s32 (!%p191_p9), 2, %v246_v28  ;;  %v327_v36 = vsub.s32 (!%p191_p9), 3, %v246_v28  ;;  %s429_s27 = sshll.u32 (!%p191_p9), %s215_s26, 4  ;;  %s748_s8 = scalar_lea.hbm (!%p191_p9), %s795_s5, %s490_s24  ;;  %s750_s27 = int_to_ptr.vmem [resolvable:$true] %s429_s27 }
  0x14   : > { %s417_s9 = scalar_lea.sflag (!%p191_p9), [#allocation4], %s214_s19  ;;  %s552_s10 = scalar_lea.vmem (!%p191_p9), %s750_s27, 16 }
  0x15   : > { %540 = vset.pattern.permute.xlu0 (!%p191_p9), %v617_v2  ;;  %258 = vperm.xlu1 (!%p191_p9), %536, %v222_v3   ;;  %p553_p11 = scmp.ne.s32.totalorder (!%p191_p9), %s750_s27, %s552_s10 }
  0x16   : > { %266 = vperm.xlu0 (!%p191_p9), %540, %v224_v4  }
  0x17   : > { %s217_s13 = scalar_select %p216_p10, %s675_s4, 1 }
  0x18   : > { %p554_p12 = pnand %p553_p11, %p692_p5  ;;  %s620_s4 = smov [#allocation3]  }
  0x19   : > { %262 = vperm.xlu1 %536, %v223_v5   ;;  %s488_s14 = sshll.u32 %s217_s13, 2  ;;  %s556_s11 = sshll.u32 %s620_s4, 4  ;;  %s557_s11 = int_to_ptr.vmem [resolvable:$false] %s556_s11 }
  0x1a   : > { %543 = vset.pattern.permute.xlu0 %v618_v6  ;;  %s219_s17 = scalar_lea.vmem %s790_s0, %s488_s14  ;;  %p555_p13 = pneg %p554_p12 }
  0x1b   : > { %314 = vperm.xlu0 %543, %v222_v3   ;;  %v220_v33 = vld [vmem:[%s219_s17] sm:$0xf]  ;;  %s558_s12 = scalar_lea.vmem %s557_s11, 32  ;;  %p559_p0 = scmp.lt.s32.totalorder %s750_s27, %s557_s11 }
  0x1c   : > { %v248_v35 = vrot.slane %v220_v33, %v247_v29  ;;  %v272_v38 = vrot.slane %v220_v33, %v271_v32  ;;  %v300_v41 = vrot.slane %v220_v33, %v299_v34  ;;  %v328_v44 = vrot.slane %v220_v33, %v327_v36  ;;  %p560_p1 = scmp.lt.s32.totalorder %s558_s12, %s552_s10 }
  0x1d   : > { %538 = vset.pattern.permute.xlu1 %v616_v1 }
  0x1e   : > { %286 = vperm.xlu1 %538, %v222_v3   ;;  %p561_p2 = por %p560_p1, %p559_p0 }
  0x1f   : > { %322 = vperm.xlu0 %543, %v224_v4  }
  0x20   : > { %p562_p3 = pnand %p561_p2, %p555_p13 }
  0x22   : > { %539 = vset.pattern.permute.xlu1 %v619_v7 }
  0x23   : > { %546 = vset.pattern.permute.xlu0 %v619_v7  ;;  %242 = vperm.xlu1 %539, %v224_v4  }
  0x24   : > { %227 = vperm.xlu0 %546, %v221_v0  }
  0x27   : > { %541 = vset.pattern.permute.xlu1 %v616_v1 }
  0x28   : > { %232 = vperm.xlu0 %546, %v222_v3   ;;  %290 = vperm.xlu1 %541, %v223_v5  }
  0x2c   : > { %237 = vperm.xlu0 %546, %v223_v5   ;;  %542 = vset.pattern.permute.xlu1 %v618_v6 }
  0x2d   : > { %310 = vperm.xlu1 %542, %v221_v0  }
  0x30   : > { %348 = vperm.xlu0 %546, %v338_v8  }
  0x31   : > { %544 = vset.pattern.permute.xlu1 %v616_v1 }
  0x32   : > { %294 = vperm.xlu1 %544, %v224_v4  }
  0x34   : > { %375 = vperm.xlu0 %546, %v369_v9  }
  0x36   : > { %545 = vset.pattern.permute.xlu1 %v618_v6 }
  0x37   : > { %318 = vperm.xlu1 %545, %v223_v5  }
  0x38   : > { %385 = vperm.xlu0 %546, %v371_v10  }
  0x3b   : > { %547 = vset.pattern.permute.xlu1 %v619_v7 }
  0x3c   : > { %343 = vperm.xlu1 %547, %v337_v11  }
  0x40   : > { %353 = vperm.xlu1 %547, %v339_v12  }
  0x44   : > { %358 = vperm.xlu1 %547, %v340_v13  }
  0x48   : > { %380 = vperm.xlu1 %547, %v370_v14  }
  0x4c   : > { %390 = vperm.xlu1 %547, %v372_v15  }
  0x90   : > { %v255_v16 = vpop.permute.xlu1 %254  ;;  %v283_v17 = vpop.permute.xlu0 %282 }
  0x91   : > { %v273_v45 = vmul.f32 %v272_v38, %v255_v16  ;;  %v301_v52 = vmul.f32 %v300_v41, %v283_v17 }
  0x94   : > { %v259_v18 = vpop.permute.xlu1 %258 }
  0x95   : > { %v267_v19 = vpop.permute.xlu0 %266  ;;  %v274_v42 = vmul.f32 %v272_v38, %v259_v18 }
  0x96   : > { %v276_v53 = vmul.f32 %v272_v38, %v267_v19 }
  0x98   : > { %v263_v20 = vpop.permute.xlu1 %262 }
  0x99   : > { %v275_v49 = vmul.f32 %v272_v38, %v263_v20 }
  0x9a   : > { %v315_v21 = vpop.permute.xlu0 %314 }
  0x9b   : > { %v330_v54 = vmul.f32 %v328_v44, %v315_v21 }
  0x9d   : > { %v287_v22 = vpop.permute.xlu1 %286 }
  0x9e   : > { %v323_v23 = vpop.permute.xlu0 %322  ;;  %v302_v50 = vmul.f32 %v300_v41, %v287_v22 }
  0x9f   : > { %v332_v9 = vmul.f32 %v328_v44, %v323_v23 }
  0xa2   : > { %v243_v24 = vpop.permute.xlu1 %242 }
  0xa3   : > { %v228_v26 = vpop.permute.xlu0 %227  ;;  %v252_v55 = vmul.f32 %v248_v35, %v243_v24 }
  0xa4   : > { %v249_v43 = vmul.f32 %v248_v35, %v228_v26 }
  0xa5   : > { %v280_v1 = vadd.f32 %v276_v53, %v252_v55 }
  0xa6   : > { %v277_v51 = vadd.f32 %v273_v45, %v249_v43 }
  0xa7   : > { %v291_v27 = vpop.permute.xlu1 %290  ;;  %v233_v31 = vpop.permute.xlu0 %232 }
  0xa8   : > { %v250_v39 = vmul.f32 %v248_v35, %v233_v31  ;;  %v303_v60 = vmul.f32 %v300_v41, %v291_v27  ;;  %v305_v63 = vadd.f32 %v301_v52, %v277_v51 }
  0xaa   : > { %v278_v46 = vadd.f32 %v274_v42, %v250_v39 }
  0xab   : > { %v238_v40 = vpop.permute.xlu0 %237 }
  0xac   : > { %v311_v30 = vpop.permute.xlu1 %310  ;;  %v251_v47 = vmul.f32 %v248_v35, %v238_v40  ;;  %v306_v58 = vadd.f32 %v302_v50, %v278_v46  ;;  %v407_v35 = vstv %s406_s18 }
  0xad   : > { %v329_v57 = vmul.f32 %v328_v44, %v311_v30 }
  0xae   : > { %v279_v56 = vadd.f32 %v275_v49, %v251_v47  ;;  %v334_v2 = vadd.f32 %v330_v54, %v306_v58 }
  0xaf   : > { %v349_v0 = vpop.permute.xlu0 %348  ;;  %v333_v3 = vadd.f32 %v329_v57, %v305_v63 }
  0xb0   : > { %v307_v4 = vadd.f32 %v303_v60, %v279_v56  ;;  %v362_v10 = vadd.f32 %v349_v0, %v334_v2 }
  0xb1   : > { %v295_v37 = vpop.permute.xlu1 %294 }
  0xb2   : > { %v304_v61 = vmul.f32 %v300_v41, %v295_v37  ;;  %v366_v16 = vmax.f32 %v362_v10, 0.0 }
  0xb3   : > { %v376_v12 = vpop.permute.xlu0 %375 }
  0xb4   : > { %v308_v6 = vadd.f32 %v304_v61, %v280_v1 }
  0xb6   : > { %v319_v48 = vpop.permute.xlu1 %318  ;;  %v336_v15 = vadd.f32 %v332_v9, %v308_v6 }
  0xb7   : > { %v331_v62 = vmul.f32 %v328_v44, %v319_v48  ;;  %v386_v22 = vpop.permute.xlu0 %385 }
  0xb9   : > { %v335_v8 = vadd.f32 %v331_v62, %v307_v4 }
  0xbb   : > { %v344_v59 = vpop.permute.xlu1 %343 }
  0xbc   : > { %v361_v7 = vadd.f32 %v344_v59, %v333_v3 }
  0xbe   : > { %v365_v14 = vmax.f32 %v361_v7, 0.0 }
  0xbf   : > { %v354_v5 = vpop.permute.xlu1 %353 }
  0xc0   : > { %v363_v11 = vadd.f32 %v354_v5, %v335_v8  ;;  %v393_v20 = vmul.f32 %v376_v12, %v365_v14 }
  0xc2   : > { %v367_v17 = vmax.f32 %v363_v11, 0.0 }
  0xc3   : > { %v359_v13 = vpop.permute.xlu1 %358 }
  0xc4   : > { %v364_v18 = vadd.f32 %v359_v13, %v336_v15  ;;  %v395_v24 = vmul.f32 %v386_v22, %v367_v17 }
  0xc6   : > { %v368_v25 = vmax.f32 %v364_v18, 0.0 }
  0xc7   : > { %v381_v19 = vpop.permute.xlu1 %380 }
  0xc8   : > { %v394_v21 = vmul.f32 %v381_v19, %v366_v16 }
  0xca   : > { %v397_v26 = vadd.f32 %v394_v21, %v393_v20 }
  0xcb   : > { %v391_v27 = vpop.permute.xlu1 %390 }
  0xcc   : > { %v396_v28 = vmul.f32 %v391_v27, %v368_v25  ;;  %v398_v23 = vadd.f32 %v397_v26, %v395_v24 }
  0xce   : > { %v399_v29 = vadd.f32 %v398_v23, %v396_v28 }
  0xd0   : > { %v400_v30 = vrot.slane %v399_v29, 4 }
  0xd2   : > { %v401_v31 = vadd.f32 %v400_v30, %v399_v29 }
  0xd4   : > { %v402_v32 = vrot.slane %v401_v31, 2 }
  0xd6   : > { %v403_v33 = vadd.f32 %v402_v32, %v401_v31 }
  0xd8   : > { %v404_v34 = vrot.slane %v403_v33, 1 }
  0xda   : > { %v405_v36 = vadd.f32 %v404_v34, %v403_v33 }
  0xdc   : > { %v408_v37 = vadd.f32 %v407_v35, %v405_v36 }
  0xde   : > { %v489_v38 = vmul.f32 -1.442695, %v408_v37 }
  0xe0   : > { %548 = vpow2.f32 %v489_v38 }
  0xea   : > { %v549_v39 = vpop.eup %548 }
  0xeb   : > { %v412_v40 = vadd.f32 1.0, %v549_v39 }
  0xed   : > { %550 = vrcp.f32 %v412_v40 }
  0xf7   : > { %v551_v41 = vpop.eup %550 }
  0xf8   : > { %415 = vst [vmem:[%s215_s26] sm:$0x1] %v551_v41 }
  0xf9   : > { %565 = shalt.err (!%p562_p3)
}
  0xfa   : > { %s566_s13 = scalar_lea.hbm %s748_s8, 16  ;;  %s570_s16 = scalar_lea.hbm %s795_s5, 32 }
  0xfb   : > { %p567_p4 = scmp.ne.s32.totalorder %s748_s8, %s566_s13  ;;  %p571_p9 = scmp.lt.u32.totalorder %s748_s8, %s795_s5 }
  0xfc   : > { %p572_p10 = scmp.lt.u32.totalorder %s570_s16, %s566_s13  ;;  %p574_p12 = scmp.lt.u32.totalorder %s566_s13, %s748_s8 }
  0xfd   : > { %p568_p7 = pnand %p567_p4, %p692_p5 }
  0xfe   : > { %p573_p11 = por %p572_p10, %p571_p9 }
  0xff   : > { %p569_p8 = pneg %p568_p7 }
 0x100   : > { %p575_p13 = por %p574_p12, %p573_p11 }
 0x102   : > { %p576_p0 = pnand %p575_p13, %p569_p8 }
 0x104   : > { %579 = shalt.err (!%p576_p0)
}
 0x105   : > { %493 = dma.vmem_to_hbm [thread:$0]  (%p692_p5), %s750_s27, 16, %s748_s8, %s417_s9  }
 0x106 PF: > { %p499_p1 = scmp.ge.s32.totalorder %s614_s23, 2  ;;  %s441_s19 = sand.u32 1, %s602_s20  }
 0x107   : > { %s442_s24 = scalar_lea.sflag [#allocation4], %s441_s19 }
 0x108   : > { %p496_p2 = pnand %p499_p1, %p696_p6 }
 0x10a   : > { %597 = dma.done.wait (!%p496_p2), %s442_s24, 16  }
 0x10b   : > { %599 = vsyncadd (!%p496_p2), %s442_s24, 4294967280  ;;  %p16_p3 = scmp.ge.s32.totalorder %s679_s25, 4   ;;  %s798_s20 = smov %s606_s21 }
 0x10c   : > { %s799_s21 = smov %s610_s22  ;;  %s800_s22 = smov %s690_s28 }
 0x10d   : > { %s801_s23 = smov %s679_s25  ;;  %18 = sbr.rel (!%p16_p3) target bundleno = 5 (0x5), region = 75 }
 0x114   :  { %446 = vsyncpa [#allocation4], 1 }
 0x115   :  { %448 = vsyncpa [#allocation4 + $0x1], 1 }

</bundles_post_ra>
